<compile_context>
chip_gen: v7x
topology: tpu7x:2x2x1
jax: 0.10.0
libtpu: 0.0.40
codegen_flags: <defaults>
</compile_context>

<pallas_src>
import jax
import jax.numpy as jnp
import numpy as np
from jax.experimental import pallas as pl
from jax.experimental.pallas import tpu as pltpu


# PyTorch Net layer dims (in, out), in forward order.
LAYER_DIMS = [(15, 32), (32, 64), (64, 128), (128, 256),
              (256, 128), (128, 32), (32, 8), (8, 1)]
NUM_LAYERS = len(LAYER_DIMS)
IN_PAD = 16                    # fc1 input features padded 15 -> 16
A_LAYERS = (0, 1, 2, 5, 6)     # layers packed as zero-padded 128x128 blocks
MAX_TB = 512                   # max batch tile size


def _round_up(a, m):
    return ((a + m - 1) // m) * m


def mlp_kernel(x_ref, wA_ref, w3_ref, w4_ref, b_ref, w7_ref, o_ref):
    """Whole 8-layer forward pass for one batch tile, fully VMEM-resident.

    x_ref : (TB, 16)        f32   input tile (feature 15 zero-padded to 16)
    wA_ref: (5, 128, 128)   bf16  layers 0,1,2,5,6 zero-padded, (in, out) layout
    w3_ref: (128, 256)      bf16  fc7 weight
    w4_ref: (256, 128)      bf16  fc8 weight
    b_ref : (8, 1, 256)     f32   all biases, zero-padded
    w7_ref: (1, 128)        f32   fc5 weight column as a row (only first 8 real)
    o_ref : (TB, 1)         f32   sigmoid output
    """
    bf16 = jnp.bfloat16

    # Layer 0 (fc1): (TB,16) @ (16,128) -- only the first 16 weight rows are real.
    h = jnp.dot(x_ref[...].astype(bf16), wA_ref[0, :IN_PAD, :],
                preferred_element_type=jnp.float32)
    h = jnp.maximum(h + b_ref[0, :, :128], 0.0)

    # Layer 1 (fc2): (TB,128) @ (128,128).
    h = jnp.dot(h.astype(bf16), wA_ref[1], preferred_element_type=jnp.float32)
    h = jnp.maximum(h + b_ref[1, :, :128], 0.0)

    # Layer 2 (fc6): (TB,128) @ (128,128).
    h = jnp.dot(h.astype(bf16), wA_ref[2], preferred_element_type=jnp.float32)
    h = jnp.maximum(h + b_ref[2, :, :128], 0.0)

    # Layer 3 (fc7): (TB,128) @ (128,256) -- exact shape, no padding.
    h = jnp.dot(h.astype(bf16), w3_ref[...], preferred_element_type=jnp.float32)
    h = jnp.maximum(h + b_ref[3], 0.0)

    # Layer 4 (fc8): (TB,256) @ (256,128) -- exact shape, no padding.
    h = jnp.dot(h.astype(bf16), w4_ref[...], preferred_element_type=jnp.float32)
    h = jnp.maximum(h + b_ref[4, :, :128], 0.0)

    # Layer 5 (fc3): (TB,128) @ (128,128).
    h = jnp.dot(h.astype(bf16), wA_ref[3], preferred_element_type=jnp.float32)
    h = jnp.maximum(h + b_ref[5, :, :128], 0.0)

    # Layer 6 (fc4): (TB,128) @ (128,128) -- only the first 8 output cols real.
    h = jnp.dot(h.astype(bf16), wA_ref[4], preferred_element_type=jnp.float32)
    h = jnp.maximum(h + b_ref[6, :, :128], 0.0)

    # Layer 7 (fc5, 8->1) on the VPU/XLU: multiply + row-reduce, no MXU pass.
    z = jnp.sum(h * w7_ref[...], axis=-1, keepdims=True) + b_ref[7, :, :1]
    o_ref[...] = jax.nn.sigmoid(z)


@jax.jit
def net_forward(x, wA, w3, w4, b_all, w7_row):
    B = x.shape[0]
    # Pad feature dim 15 -> 16 (zero column); the matching weight row is zero.
    x16 = jnp.pad(x.astype(jnp.float32), ((0, 0), (0, IN_PAD - x.shape[1])))

    # Batch tile: aim for >= 2 grid steps (so v7x's two TensorCores both get
    # work via dimension_semantics=("parallel",)), capped at MAX_TB rows.
    if B <= 2 * MAX_TB:
        tb = min(B, max(8, _round_up(pl.cdiv(B, 2), 8)))
    else:
        tb = MAX_TB
    grid = (pl.cdiv(B, tb),)

    return pl.pallas_call(
        mlp_kernel,
        out_shape=jax.ShapeDtypeStruct((B, 1), jnp.float32),
        grid=grid,
        in_specs=[
            pl.BlockSpec((tb, IN_PAD), lambda i: (i, 0)),
            # Constant index_maps: fetched once, stay VMEM-resident across steps.
            pl.BlockSpec((len(A_LAYERS), 128, 128), lambda i: (0, 0, 0)),
            pl.BlockSpec((128, 256), lambda i: (0, 0)),
            pl.BlockSpec((256, 128), lambda i: (0, 0)),
            pl.BlockSpec((NUM_LAYERS, 1, 256), lambda i: (0, 0, 0)),
            pl.BlockSpec((1, 128), lambda i: (0, 0)),
        ],
        out_specs=pl.BlockSpec((tb, 1), lambda i: (i, 0)),
        compiler_params=pltpu.CompilerParams(
            dimension_semantics=("parallel",)),
    )(x16, wA, w3, w4, b_all, w7_row)


def make_params(key):
    """Deterministic parameter init (PyTorch-Linear-style uniform bounds)."""
    params = []
    for (fan_in, fan_out) in LAYER_DIMS:
        key, kw, kb = jax.random.split(key, 3)
        bound = 1.0 / np.sqrt(fan_in)
        w = jax.random.uniform(kw, (fan_in, fan_out), jnp.float32, -bound, bound)
        b = jax.random.uniform(kb, (fan_out,), jnp.float32, -bound, bound)
        params.append((w, b))
    return params


def pack_params(params):
    """Pack the 8 (W, b) pairs into 5 kernel inputs (bf16 weights, f32 biases)."""
    wA = np.zeros((len(A_LAYERS), 128, 128), np.float32)
    for slot, li in enumerate(A_LAYERS):
        w, _ = params[li]
        wA[slot, :w.shape[0], :w.shape[1]] = np.asarray(w)
    w3 = np.asarray(params[3][0], np.float32)            # (128, 256), exact
    w4 = np.asarray(params[4][0], np.float32)            # (256, 128), exact
    b_all = np.zeros((NUM_LAYERS, 1, 256), np.float32)
    for i, (_, b) in enumerate(params):
        b_all[i, 0, :b.shape[0]] = np.asarray(b)
    w7_row = np.zeros((1, 128), np.float32)
    w7_row[0, :8] = np.asarray(params[7][0])[:, 0]       # (8,1) column -> row
    return (jnp.asarray(wA, jnp.bfloat16), jnp.asarray(w3, jnp.bfloat16),
            jnp.asarray(w4, jnp.bfloat16), jnp.asarray(b_all),
            jnp.asarray(w7_row))


def reference_forward(x, params):
    h = x.astype(jnp.float32)
    for i, (w, b) in enumerate(params):
        h = h @ w + b
        h = jax.nn.sigmoid(h) if i == NUM_LAYERS - 1 else jnp.maximum(h, 0.0)
    return h


if __name__ == "__main__":
    key = jax.random.PRNGKey(0)
    key, kx = jax.random.split(key)
    params = make_params(key)
    packed = pack_params(params)

    # bf16 weights/activations with f32 accumulation => loosened tolerance.
    TOL = 2e-2

    # Small batch (single grid step).
    B = 8
    x = jax.random.normal(kx, (B, 15), jnp.float32)
    out = net_forward(x, *packed)
    jax.block_until_ready(out)
    ref = reference_forward(x, params)
    assert out.shape == (B, 1)
    assert jnp.allclose(out, ref, atol=TOL, rtol=TOL), "mismatch vs JAX reference (B=8)"

    # Medium batch: 2 grid steps with a non-power-of-two tile.
    key, kx1 = jax.random.split(key)
    B1 = 48
    x1 = jax.random.normal(kx1, (B1, 15), jnp.float32)
    out1 = net_forward(x1, *packed)
    jax.block_until_ready(out1)
    ref1 = reference_forward(x1, params)
    assert out1.shape == (B1, 1)
    assert jnp.allclose(out1, ref1, atol=TOL, rtol=TOL), "mismatch vs JAX reference (B=48)"

    # Larger batch: exercises the batch-tiled grid / parallel dimension path.
    key, kx2 = jax.random.split(key)
    B2 = 512
    x2 = jax.random.normal(kx2, (B2, 15), jnp.float32)
    out2 = net_forward(x2, *packed)
    jax.block_until_ready(out2)
    ref2 = reference_forward(x2, params)
    assert out2.shape == (B2, 1)
    assert jnp.allclose(out2, ref2, atol=TOL, rtol=TOL), "mismatch vs JAX reference (B=512)"

    print("KERNEL_OK")
</pallas_src>

<mosaic_0001>
module attributes {stable_mosaic.version = 11 : i64} {
  func.func @mlp_kernel(%arg0: i32, %arg1: memref<8x16xf32, #tpu.memory_space<vmem>>, %arg2: memref<5x128x128xbf16, #tpu.memory_space<vmem>>, %arg3: memref<128x256xbf16, #tpu.memory_space<vmem>>, %arg4: memref<256x128xbf16, #tpu.memory_space<vmem>>, %arg5: memref<8x1x256xf32, #tpu.memory_space<vmem>>, %arg6: memref<1x128xf32, #tpu.memory_space<vmem>>, %arg7: memref<8x1xf32, #tpu.memory_space<vmem>>) attributes {dimension_semantics = [#tpu.dimension_semantics<parallel>], iteration_bounds = array<i64: 1>, scalar_prefetch = 0 : i64, scratch_operands = 0 : i64, tpu.core_type = #tpu.core_type<tc>, window_params = [{transform_indices = @transform_0, window_bounds = array<i64: 8, 16>}, {pipeline_mode = #tpu.pipeline_mode<synchronous>, transform_indices = @transform_1, window_bounds = array<i64: 5, 128, 128>}, {pipeline_mode = #tpu.pipeline_mode<synchronous>, transform_indices = @transform_2, window_bounds = array<i64: 128, 256>}, {pipeline_mode = #tpu.pipeline_mode<synchronous>, transform_indices = @transform_3, window_bounds = array<i64: 256, 128>}, {pipeline_mode = #tpu.pipeline_mode<synchronous>, transform_indices = @transform_4, window_bounds = array<i64: 8, 1, 256>}, {pipeline_mode = #tpu.pipeline_mode<synchronous>, transform_indices = @transform_5, window_bounds = array<i64: 1, 128>}, {transform_indices = @transform_6, window_bounds = array<i64: 8, 1>}]} {
    %c0 = arith.constant 0 : index
    %c0_0 = arith.constant 0 : index
    %0 = vector.load %arg1[%c0, %c0_0] : memref<8x16xf32, #tpu.memory_space<vmem>>, vector<8x16xf32>
    %1 = arith.truncf %0 : vector<8x16xf32> to vector<8x16xbf16>
    %c0_1 = arith.constant 0 : index
    %c0_2 = arith.constant 0 : index
    %c0_3 = arith.constant 0 : index
    %2 = vector.load %arg2[%c0_1, %c0_2, %c0_3] : memref<5x128x128xbf16, #tpu.memory_space<vmem>>, vector<1x16x128xbf16>
    %3 = vector.shape_cast %2 : vector<1x16x128xbf16> to vector<16x128xbf16>
    %cst = arith.constant dense<0.000000e+00> : vector<8x128xf32>
    %4 = tpu.matmul %1, %3, %cst {dimension_numbers = #tpu.dot_dimension_numbers<[1], [0], [0], [1], [0, 0, 1, 1], [], []>} : vector<8x16xbf16>, vector<16x128xbf16>, vector<8x128xf32> -> vector<8x128xf32>
    %c0_4 = arith.constant 0 : index
    %c0_5 = arith.constant 0 : index
    %c0_6 = arith.constant 0 : index
    %5 = vector.load %arg5[%c0_4, %c0_5, %c0_6] : memref<8x1x256xf32, #tpu.memory_space<vmem>>, vector<1x1x128xf32>
    %6 = vector.shape_cast %5 : vector<1x1x128xf32> to vector<1x128xf32>
    %7 = vector.broadcast %6 : vector<1x128xf32> to vector<8x128xf32>
    %8 = arith.addf %4, %7 : vector<8x128xf32>
    %cst_7 = arith.constant 0.000000e+00 : f32
    %9 = vector.broadcast %cst_7 : f32 to vector<8x128xf32>
    %10 = arith.maximumf %8, %9 : vector<8x128xf32>
    %11 = arith.truncf %10 : vector<8x128xf32> to vector<8x128xbf16>
    %c1 = arith.constant 1 : index
    %c0_8 = arith.constant 0 : index
    %c0_9 = arith.constant 0 : index
    %12 = vector.load %arg2[%c1, %c0_8, %c0_9] : memref<5x128x128xbf16, #tpu.memory_space<vmem>>, vector<1x128x128xbf16>
    %13 = vector.shape_cast %12 : vector<1x128x128xbf16> to vector<128x128xbf16>
    %cst_10 = arith.constant dense<0.000000e+00> : vector<8x128xf32>
    %14 = tpu.matmul %11, %13, %cst_10 {dimension_numbers = #tpu.dot_dimension_numbers<[1], [0], [0], [1], [0, 0, 1, 1], [], []>} : vector<8x128xbf16>, vector<128x128xbf16>, vector<8x128xf32> -> vector<8x128xf32>
    %c1_11 = arith.constant 1 : index
    %c0_12 = arith.constant 0 : index
    %c0_13 = arith.constant 0 : index
    %15 = vector.load %arg5[%c1_11, %c0_12, %c0_13] : memref<8x1x256xf32, #tpu.memory_space<vmem>>, vector<1x1x128xf32>
    %16 = vector.shape_cast %15 : vector<1x1x128xf32> to vector<1x128xf32>
    %17 = vector.broadcast %16 : vector<1x128xf32> to vector<8x128xf32>
    %18 = arith.addf %14, %17 : vector<8x128xf32>
    %cst_14 = arith.constant 0.000000e+00 : f32
    %19 = vector.broadcast %cst_14 : f32 to vector<8x128xf32>
    %20 = arith.maximumf %18, %19 : vector<8x128xf32>
    %21 = arith.truncf %20 : vector<8x128xf32> to vector<8x128xbf16>
    %c2 = arith.constant 2 : index
    %c0_15 = arith.constant 0 : index
    %c0_16 = arith.constant 0 : index
    %22 = vector.load %arg2[%c2, %c0_15, %c0_16] : memref<5x128x128xbf16, #tpu.memory_space<vmem>>, vector<1x128x128xbf16>
    %23 = vector.shape_cast %22 : vector<1x128x128xbf16> to vector<128x128xbf16>
    %cst_17 = arith.constant dense<0.000000e+00> : vector<8x128xf32>
    %24 = tpu.matmul %21, %23, %cst_17 {dimension_numbers = #tpu.dot_dimension_numbers<[1], [0], [0], [1], [0, 0, 1, 1], [], []>} : vector<8x128xbf16>, vector<128x128xbf16>, vector<8x128xf32> -> vector<8x128xf32>
    %c2_18 = arith.constant 2 : index
    %c0_19 = arith.constant 0 : index
    %c0_20 = arith.constant 0 : index
    %25 = vector.load %arg5[%c2_18, %c0_19, %c0_20] : memref<8x1x256xf32, #tpu.memory_space<vmem>>, vector<1x1x128xf32>
    %26 = vector.shape_cast %25 : vector<1x1x128xf32> to vector<1x128xf32>
    %27 = vector.broadcast %26 : vector<1x128xf32> to vector<8x128xf32>
    %28 = arith.addf %24, %27 : vector<8x128xf32>
    %cst_21 = arith.constant 0.000000e+00 : f32
    %29 = vector.broadcast %cst_21 : f32 to vector<8x128xf32>
    %30 = arith.maximumf %28, %29 : vector<8x128xf32>
    %31 = arith.truncf %30 : vector<8x128xf32> to vector<8x128xbf16>
    %c0_22 = arith.constant 0 : index
    %c0_23 = arith.constant 0 : index
    %32 = vector.load %arg3[%c0_22, %c0_23] : memref<128x256xbf16, #tpu.memory_space<vmem>>, vector<128x256xbf16>
    %cst_24 = arith.constant dense<0.000000e+00> : vector<8x256xf32>
    %33 = tpu.matmul %31, %32, %cst_24 {dimension_numbers = #tpu.dot_dimension_numbers<[1], [0], [0], [1], [0, 0, 1, 1], [], []>} : vector<8x128xbf16>, vector<128x256xbf16>, vector<8x256xf32> -> vector<8x256xf32>
    %c3 = arith.constant 3 : index
    %c0_25 = arith.constant 0 : index
    %c0_26 = arith.constant 0 : index
    %34 = vector.load %arg5[%c3, %c0_25, %c0_26] : memref<8x1x256xf32, #tpu.memory_space<vmem>>, vector<1x1x256xf32>
    %35 = vector.shape_cast %34 : vector<1x1x256xf32> to vector<1x256xf32>
    %36 = vector.broadcast %35 : vector<1x256xf32> to vector<8x256xf32>
    %37 = arith.addf %33, %36 : vector<8x256xf32>
    %cst_27 = arith.constant 0.000000e+00 : f32
    %38 = vector.broadcast %cst_27 : f32 to vector<8x256xf32>
    %39 = arith.maximumf %37, %38 : vector<8x256xf32>
    %40 = arith.truncf %39 : vector<8x256xf32> to vector<8x256xbf16>
    %c0_28 = arith.constant 0 : index
    %c0_29 = arith.constant 0 : index
    %41 = vector.load %arg4[%c0_28, %c0_29] : memref<256x128xbf16, #tpu.memory_space<vmem>>, vector<256x128xbf16>
    %cst_30 = arith.constant dense<0.000000e+00> : vector<8x128xf32>
    %42 = tpu.matmul %40, %41, %cst_30 {dimension_numbers = #tpu.dot_dimension_numbers<[1], [0], [0], [1], [0, 0, 1, 1], [], []>} : vector<8x256xbf16>, vector<256x128xbf16>, vector<8x128xf32> -> vector<8x128xf32>
    %c4 = arith.constant 4 : index
    %c0_31 = arith.constant 0 : index
    %c0_32 = arith.constant 0 : index
    %43 = vector.load %arg5[%c4, %c0_31, %c0_32] : memref<8x1x256xf32, #tpu.memory_space<vmem>>, vector<1x1x128xf32>
    %44 = vector.shape_cast %43 : vector<1x1x128xf32> to vector<1x128xf32>
    %45 = vector.broadcast %44 : vector<1x128xf32> to vector<8x128xf32>
    %46 = arith.addf %42, %45 : vector<8x128xf32>
    %cst_33 = arith.constant 0.000000e+00 : f32
    %47 = vector.broadcast %cst_33 : f32 to vector<8x128xf32>
    %48 = arith.maximumf %46, %47 : vector<8x128xf32>
    %49 = arith.truncf %48 : vector<8x128xf32> to vector<8x128xbf16>
    %c3_34 = arith.constant 3 : index
    %c0_35 = arith.constant 0 : index
    %c0_36 = arith.constant 0 : index
    %50 = vector.load %arg2[%c3_34, %c0_35, %c0_36] : memref<5x128x128xbf16, #tpu.memory_space<vmem>>, vector<1x128x128xbf16>
    %51 = vector.shape_cast %50 : vector<1x128x128xbf16> to vector<128x128xbf16>
    %cst_37 = arith.constant dense<0.000000e+00> : vector<8x128xf32>
    %52 = tpu.matmul %49, %51, %cst_37 {dimension_numbers = #tpu.dot_dimension_numbers<[1], [0], [0], [1], [0, 0, 1, 1], [], []>} : vector<8x128xbf16>, vector<128x128xbf16>, vector<8x128xf32> -> vector<8x128xf32>
    %c5 = arith.constant 5 : index
    %c0_38 = arith.constant 0 : index
    %c0_39 = arith.constant 0 : index
    %53 = vector.load %arg5[%c5, %c0_38, %c0_39] : memref<8x1x256xf32, #tpu.memory_space<vmem>>, vector<1x1x128xf32>
    %54 = vector.shape_cast %53 : vector<1x1x128xf32> to vector<1x128xf32>
    %55 = vector.broadcast %54 : vector<1x128xf32> to vector<8x128xf32>
    %56 = arith.addf %52, %55 : vector<8x128xf32>
    %cst_40 = arith.constant 0.000000e+00 : f32
    %57 = vector.broadcast %cst_40 : f32 to vector<8x128xf32>
    %58 = arith.maximumf %56, %57 : vector<8x128xf32>
    %59 = arith.truncf %58 : vector<8x128xf32> to vector<8x128xbf16>
    %c4_41 = arith.constant 4 : index
    %c0_42 = arith.constant 0 : index
    %c0_43 = arith.constant 0 : index
    %60 = vector.load %arg2[%c4_41, %c0_42, %c0_43] : memref<5x128x128xbf16, #tpu.memory_space<vmem>>, vector<1x128x128xbf16>
    %61 = vector.shape_cast %60 : vector<1x128x128xbf16> to vector<128x128xbf16>
    %cst_44 = arith.constant dense<0.000000e+00> : vector<8x128xf32>
    %62 = tpu.matmul %59, %61, %cst_44 {dimension_numbers = #tpu.dot_dimension_numbers<[1], [0], [0], [1], [0, 0, 1, 1], [], []>} : vector<8x128xbf16>, vector<128x128xbf16>, vector<8x128xf32> -> vector<8x128xf32>
    %c6 = arith.constant 6 : index
    %c0_45 = arith.constant 0 : index
    %c0_46 = arith.constant 0 : index
    %63 = vector.load %arg5[%c6, %c0_45, %c0_46] : memref<8x1x256xf32, #tpu.memory_space<vmem>>, vector<1x1x128xf32>
    %64 = vector.shape_cast %63 : vector<1x1x128xf32> to vector<1x128xf32>
    %65 = vector.broadcast %64 : vector<1x128xf32> to vector<8x128xf32>
    %66 = arith.addf %62, %65 : vector<8x128xf32>
    %cst_47 = arith.constant 0.000000e+00 : f32
    %67 = vector.broadcast %cst_47 : f32 to vector<8x128xf32>
    %68 = arith.maximumf %66, %67 : vector<8x128xf32>
    %c0_48 = arith.constant 0 : index
    %c0_49 = arith.constant 0 : index
    %69 = vector.load %arg6[%c0_48, %c0_49] : memref<1x128xf32, #tpu.memory_space<vmem>>, vector<1x128xf32>
    %70 = vector.broadcast %69 : vector<1x128xf32> to vector<8x128xf32>
    %71 = arith.mulf %68, %70 : vector<8x128xf32>
    %cst_50 = arith.constant dense<0.000000e+00> : vector<8xf32>
    %72 = vector.multi_reduction <add>, %71, %cst_50 [1] : vector<8x128xf32> to vector<8xf32>
    %73 = vector.shape_cast %72 : vector<8xf32> to vector<8x1xf32>
    %c7 = arith.constant 7 : index
    %c0_51 = arith.constant 0 : index
    %c0_52 = arith.constant 0 : index
    %74 = vector.load %arg5[%c7, %c0_51, %c0_52] : memref<8x1x256xf32, #tpu.memory_space<vmem>>, vector<1x1x1xf32>
    %75 = vector.shape_cast %74 : vector<1x1x1xf32> to vector<1x1xf32>
    %76 = vector.broadcast %75 : vector<1x1xf32> to vector<8x1xf32>
    %77 = arith.addf %73, %76 : vector<8x1xf32>
    %78 = arith.negf %77 : vector<8x1xf32>
    %79 = math.exp %78 : vector<8x1xf32>
    %cst_53 = arith.constant 1.000000e+00 : f32
    %80 = vector.broadcast %cst_53 : f32 to vector<8x1xf32>
    %81 = arith.addf %80, %79 : vector<8x1xf32>
    %82 = arith.divf %80, %81 : vector<8x1xf32>
    %c0_54 = arith.constant 0 : index
    %c0_55 = arith.constant 0 : index
    %83 = vector.load %arg7[%c0_54, %c0_55] : memref<8x1xf32, #tpu.memory_space<vmem>>, vector<8x1xf32>
    tpu.vector_store %arg7[%c0_54, %c0_55], %82 {strides = array<i32>} : memref<8x1xf32, #tpu.memory_space<vmem>>, vector<8x1xf32>,
    return
  }
  func.func @transform_0(%arg0: i32) -> (i32, i32) {
    %c0_i32 = arith.constant 0 : i32
    %c0_i32_0 = arith.constant 0 : i32
    return %arg0, %c0_i32 : i32, i32
  }
  func.func @transform_1(%arg0: i32) -> (i32, i32, i32) {
    %c0_i32 = arith.constant 0 : i32
    %c0_i32_0 = arith.constant 0 : i32
    %c0_i32_1 = arith.constant 0 : i32
    %c0_i32_2 = arith.constant 0 : i32
    return %c0_i32, %c0_i32_0, %c0_i32_1 : i32, i32, i32
  }
  func.func @transform_2(%arg0: i32) -> (i32, i32) {
    %c0_i32 = arith.constant 0 : i32
    %c0_i32_0 = arith.constant 0 : i32
    %c0_i32_1 = arith.constant 0 : i32
    return %c0_i32, %c0_i32_0 : i32, i32
  }
  func.func @transform_3(%arg0: i32) -> (i32, i32) {
    %c0_i32 = arith.constant 0 : i32
    %c0_i32_0 = arith.constant 0 : i32
    %c0_i32_1 = arith.constant 0 : i32
    return %c0_i32, %c0_i32_0 : i32, i32
  }
  func.func @transform_4(%arg0: i32) -> (i32, i32, i32) {
    %c0_i32 = arith.constant 0 : i32
    %c0_i32_0 = arith.constant 0 : i32
    %c0_i32_1 = arith.constant 0 : i32
    %c0_i32_2 = arith.constant 0 : i32
    return %c0_i32, %c0_i32_0, %c0_i32_1 : i32, i32, i32
  }
  func.func @transform_5(%arg0: i32) -> (i32, i32) {
    %c0_i32 = arith.constant 0 : i32
    %c0_i32_0 = arith.constant 0 : i32
    %c0_i32_1 = arith.constant 0 : i32
    return %c0_i32, %c0_i32_0 : i32, i32
  }
  func.func @transform_6(%arg0: i32) -> (i32, i32) {
    %c0_i32 = arith.constant 0 : i32
    %c0_i32_0 = arith.constant 0 : i32
    return %arg0, %c0_i32 : i32, i32
  }
}

</mosaic_0001>

<bundles_post_ra>
// kernel: net_forward.1
= control target key start
LH: loop header
LB: loop body
LE: loop exit
PB: predicated region body
PF: predicated region fallthrough
CT: control target
= control target key end

     0   :  { %11 = vsyncpa [#allocation3], 0  ;;  %s1494_s0 = inlined_call_operand.vmem [shape: f32[8,16], index: 0, kind: input, shape index: {}]   ;;  %s1495_s1 = inlined_call_operand.hbm [shape: bf16[5,128,128], index: 1, kind: input, shape index: {}]   ;;  %s1496_s2 = inlined_call_operand.hbm [shape: bf16[128,256], index: 2, kind: input, shape index: {}]   ;;  %s1497_s3 = inlined_call_operand.hbm [shape: bf16[256,128], index: 3, kind: input, shape index: {}]   ;;  %s1498_s4 = inlined_call_operand.vmem [shape: f32[8,1,256], index: 4, kind: input, shape index: {}]   ;;  %s1499_s5 = inlined_call_operand.vmem [shape: f32[1,128], index: 5, kind: input, shape index: {}]   ;;  %s1500_s6 = inlined_call_operand.vmem [shape: f32[8,1], index: 6, kind: output, shape index: {}]  }
   0x1   :  { %12 = vsyncpa [#allocation5], 0  ;;  %s1337_s21 = smov [#allocation4]   ;;  %s1267_s25 = scalar_lea.hbm %s1496_s2, 2048 }
   0x2   :  { %s32_s22 = sshll.u32 %s1337_s21, 4  ;;  %p1268_p0 = scmp.ne.s32.totalorder %s1496_s2, %s1267_s25  ;;  %s33_s22 = int_to_ptr.vmem [resolvable:$true] %s32_s22 }
   0x3   :  { %p1271_p1 = scmp.lt.u32.totalorder %s1267_s25, %s1496_s2 }
   0x5   :  { %p1273_p2 = pnand %p1271_p1, %p1268_p0 }
   0x7   :  { %1276 = shalt.err (!%p1273_p2)
}
   0x8   :  { %s1277_s30 = scalar_lea.vmem %s33_s22, 2048  ;;  %p1282_p4 = scmp.lt.s32.totalorder %s33_s22, %s33_s22 }
   0x9   :  { %p1278_p3 = scmp.ne.s32.totalorder %s33_s22, %s1277_s30  ;;  %p1283_p5 = scmp.lt.s32.totalorder %s1277_s30, %s1277_s30 }
   0xb   :  { %p1284_p6 = por %p1283_p5, %p1282_p4 }
   0xd   :  { %p1285_p7 = pnand %p1284_p6, %p1278_p3 }
   0xf   :  { %1288 = shalt.err (!%p1285_p7)
}
  0x10   :  { %s1338_s7 = smov 128   ;;  %s1339_s8 = smov 8  }
  0x11   :  { %38 = dma.hbm_to_vmem [thread:$0]  %s1496_s2, 2048, %s33_s22, [#allocation5], %s1338_s7, %s1338_s7, %s1339_s8  }
  0x12   :  { %s1340_s11 = smov [#allocation2]   ;;  %s1289_s15 = scalar_lea.hbm %s1495_s1, 5120 }
  0x13   :  { %s20_s12 = sshll.u32 %s1340_s11, 4  ;;  %p1290_p8 = scmp.ne.s32.totalorder %s1495_s1, %s1289_s15  ;;  %s21_s12 = int_to_ptr.vmem [resolvable:$true] %s20_s12 }
  0x14   :  { %p1293_p9 = scmp.lt.u32.totalorder %s1289_s15, %s1495_s1 }
  0x16   :  { %p1295_p10 = pnand %p1293_p9, %p1290_p8 }
  0x18   :  { %1298 = shalt.err (!%p1295_p10)
}
  0x19   :  { %s1299_s20 = scalar_lea.vmem %s21_s12, 5120  ;;  %p1304_p12 = scmp.lt.s32.totalorder %s21_s12, %s21_s12 }
  0x1a   :  { %p1300_p11 = scmp.ne.s32.totalorder %s21_s12, %s1299_s20  ;;  %p1305_p13 = scmp.lt.s32.totalorder %s1299_s20, %s1299_s20 }
  0x1c   :  { %p1306_p0 = por %p1305_p13, %p1304_p12 }
  0x1e   :  { %p1307_p1 = pnand %p1306_p0, %p1300_p11 }
  0x20   :  { %1310 = shalt.err (!%p1307_p1)
}
  0x21   :  { %s1341_s2 = smov 64   ;;  %s1342_s21 = smov 4  }
  0x22   :  { %26 = dma.hbm_to_vmem [thread:$0]  %s1495_s1, 5120, %s21_s12, [#allocation3], %s1341_s2, %s1341_s2, %s1342_s21  }
  0x23   :  { %s1343_s24 = smov [#allocation6]   ;;  %s1311_s28 = scalar_lea.hbm %s1497_s3, 2048 }
  0x24   :  { %s44_s25 = sshll.u32 %s1343_s24, 4  ;;  %p1312_p2 = scmp.ne.s32.totalorder %s1497_s3, %s1311_s28  ;;  %s45_s25 = int_to_ptr.vmem [resolvable:$true] %s44_s25 }
  0x25   :  { %p1315_p3 = scmp.lt.u32.totalorder %s1311_s28, %s1497_s3 }
  0x27   :  { %p1317_p4 = pnand %p1315_p3, %p1312_p2 }
  0x29   :  { %1320 = shalt.err (!%p1317_p4)
}
  0x2a   :  { %s1321_s9 = scalar_lea.vmem %s45_s25, 2048  ;;  %p1326_p6 = scmp.lt.s32.totalorder %s45_s25, %s45_s25 }
  0x2b   :  { %p1322_p5 = scmp.ne.s32.totalorder %s45_s25, %s1321_s9  ;;  %p1327_p7 = scmp.lt.s32.totalorder %s1321_s9, %s1321_s9 }
  0x2d   :  { %p1328_p8 = por %p1327_p7, %p1326_p6 }
  0x2f   :  { %p1329_p9 = pnand %p1328_p8, %p1322_p5 }
  0x31   :  { %1332 = shalt.err (!%p1329_p9)
}
  0x32   :  { %50 = dma.hbm_to_vmem [thread:$0]  %s1497_s3, 2048, %s45_s25, [#allocation5], %s1341_s2, %s1341_s2, %s1342_s21  }
  0x33   :  { %1333 = dma.done.wait [#allocation3], 5120  }
  0x34   :  { %1334 = vsyncadd [#allocation3], 4294962176 }
  0x35   :  { %1335 = dma.done.wait [#allocation5], 4096  }
  0x36   :  { %1336 = vsyncadd [#allocation5], 4294963200  ;;  %v1344_v0 = vmov 0.0   ;;  %vm1345_vm0 = vmmov 0   ;;  %v1190_v1 = vld [vmem:[#allocation2] sm:$0xff]   ;;  %v65_v2 = vld [vmem:[%s1494_s0] sm:$0xff] }
  0x37   :  { %1094 = vmatprep.subr.bf16.mxu0 %v1344_v0  ;;  %1096 = vmatprep.mubr.msk.bf16.mxu0 %vm1345_vm0, %v1344_v0  ;;  %v66_v3 = vpack.c.bf16 %v65_v2, %v65_v2  ;;  %vm82_vm1 = vcmask 130048   ;;  %v1191_v4 = vld [vmem:[#allocation2 + $0x40] sm:$0xff]   ;;  %v1192_v5 = vld [vmem:[#allocation2 + $0x48] sm:$0xff]   ;;  %v1193_v6 = vld [vmem:[#allocation2 + $0x50] sm:$0xff]   ;;  %v1346_v52 = vmov 0   ;;  %vm944_vm2 = vcmask 7168  }
  0x38   :  { %1100 = vmatprep.subr.bf16.mxu1 %v1344_v0  ;;  %1116 = vmatprep.mubr.msk.bf16.mxu1 %vm1345_vm0, %v1344_v0  ;;  %v1194_v7 = vld [vmem:[#allocation2 + $0x58] sm:$0xff]   ;;  %v1195_v8 = vld [vmem:[#allocation2 + $0x60] sm:$0xff]   ;;  %v1196_v9 = vld [vmem:[#allocation2 + $0x68] sm:$0xff]  }
  0x39   :  { %1095 = vmatpush3.bf16.msra.mxu0 %v1190_v1  ;;  %1101 = vmatpush3.bf16.msra.mxu1 %v1191_v4  ;;  %v1197_v10 = vld [vmem:[#allocation2 + $0x70] sm:$0xff]   ;;  %v1198_v11 = vld [vmem:[#allocation2 + $0x78] sm:$0xff]   ;;  %v1199_v12 = vld [vmem:[#allocation2 + $0x80] sm:$0xff]  }
  0x3a   :  { %1120 = vmatprep.subr.bf16.mxu0 %v1344_v0  ;;  %1102 = vmatprep.subr.bf16.mxu1 %v1344_v0  ;;  %v1200_v13 = vld [vmem:[#allocation2 + $0x88] sm:$0xff]   ;;  %v1201_v14 = vld [vmem:[#allocation2 + $0x90] sm:$0xff]   ;;  %v1202_v15 = vld [vmem:[#allocation2 + $0x98] sm:$0xff]  }
  0x3b   :  { %v1203_v16 = vld [vmem:[#allocation2 + $0xa0] sm:$0xff]   ;;  %v1204_v17 = vld [vmem:[#allocation2 + $0xa8] sm:$0xff]   ;;  %v952_v18 = vld [vmem:[%s1498_s4] ss:$0 sm:$0xff] }
  0x3c   :  { %1097 = vmatmul.mubr.msk.bf16.vlgmr.msra.gmra.mrb[0].mxu0 %vm82_vm1, %v66_v3  ;;  %v1205_v26 = vld [vmem:[#allocation2 + $0xb0] sm:$0xff]   ;;  %v1206_v27 = vld [vmem:[#allocation2 + $0xb8] sm:$0xff]   ;;  %v1207_v28 = vld [vmem:[#allocation4] ss:$8 sps:$4 sm:$0xff]  }
  0x3d   :  { %1136 = vmatprep.mubr.msk.bf16.mxu0 %vm1345_vm0, %v1344_v0  ;;  %1103 = vmatpush3.bf16.msra.mxu1 %v1192_v5  ;;  %v1209_v29 = vld [vmem:[#allocation4 + $0x4] ss:$8 sps:$4 sm:$0xff]   ;;  %v1212_v30 = vld [vmem:[#allocation4 + $0x14] ss:$8 sps:$4 sm:$0xff]   ;;  %v1210_v31 = vld [vmem:[#allocation4 + $0x10] ss:$8 sps:$4 sm:$0xff]  }
  0x3e   :  { %1104 = vmatprep.subr.bf16.mxu1 %v1344_v0  ;;  %1121 = vmatpush3.bf16.msra.mxu0 %v1199_v12  ;;  %v1215_v32 = vld [vmem:[#allocation4 + $0x24] ss:$8 sps:$4 sm:$0xff]   ;;  %v1213_v33 = vld [vmem:[#allocation4 + $0x20] ss:$8 sps:$4 sm:$0xff]   ;;  %v1218_v34 = vld [vmem:[#allocation4 + $0x34] ss:$8 sps:$4 sm:$0xff]  }
  0x3f   :  { %1122 = vmatprep.subr.bf16.mxu0 %v1344_v0  ;;  %v1216_v35 = vld [vmem:[#allocation4 + $0x30] ss:$8 sps:$4 sm:$0xff]   ;;  %v1221_v36 = vld [vmem:[#allocation4 + $0x44] ss:$8 sps:$4 sm:$0xff]   ;;  %v1219_v37 = vld [vmem:[#allocation4 + $0x40] ss:$8 sps:$4 sm:$0xff]  }
  0x40   :  { %v1224_v38 = vld [vmem:[#allocation4 + $0x54] ss:$8 sps:$4 sm:$0xff]   ;;  %v1222_v39 = vld [vmem:[#allocation4 + $0x50] ss:$8 sps:$4 sm:$0xff]   ;;  %v1227_v40 = vld [vmem:[#allocation4 + $0x64] ss:$8 sps:$4 sm:$0xff]  }
  0x41   :  { %1105 = vmatpush3.bf16.msra.mxu1 %v1193_v6  ;;  %v1225_v41 = vld [vmem:[#allocation4 + $0x60] ss:$8 sps:$4 sm:$0xff]   ;;  %v956_v42 = vld [vmem:[%s1498_s4 + $0x2] ss:$0 sm:$0xff]  ;;  %v1230_v50 = vld [vmem:[#allocation4 + $0x74] ss:$8 sps:$4 sm:$0xff]  }
  0x42   :  { %1106 = vmatprep.subr.bf16.mxu1 %v1344_v0  ;;  %1123 = vmatpush3.bf16.msra.mxu0 %v1200_v13  ;;  %v1228_v51 = vld [vmem:[#allocation4 + $0x70] ss:$8 sps:$4 sm:$0xff]   ;;  %v1231_v53 = vld [vmem:[#allocation6 + $0x40] sm:$0xff]   ;;  %v1233_v55 = vld [vmem:[#allocation6 + $0x48] sm:$0xff]  }
  0x43   :  { %1124 = vmatprep.subr.bf16.mxu0 %v1344_v0  ;;  %v1232_v54 = vld [vmem:[#allocation6] sm:$0xff]   ;;  %v1234_v56 = vld [vmem:[#allocation6 + $0x8] sm:$0xff]   ;;  %v1235_v57 = vld [vmem:[#allocation6 + $0x50] sm:$0xff]  }
  0x44   :  { %v1236_v58 = vld [vmem:[#allocation6 + $0x10] sm:$0xff]   ;;  %v1237_v59 = vld [vmem:[#allocation6 + $0x58] sm:$0xff]   ;;  %v1239_v61 = vld [vmem:[#allocation6 + $0x60] sm:$0xff]  }
  0x45   :  { %1107 = vmatpush3.bf16.msra.mxu1 %v1194_v7  ;;  %v1238_v60 = vld [vmem:[#allocation6 + $0x18] sm:$0xff]   ;;  %v1240_v62 = vld [vmem:[#allocation6 + $0x20] sm:$0xff]   ;;  %v1241_v63 = vld [vmem:[#allocation6 + $0x68] sm:$0xff]  }
  0x46   :  { %1108 = vmatprep.subr.bf16.mxu1 %v1344_v0  ;;  %1125 = vmatpush3.bf16.msra.mxu0 %v1201_v14  ;;  %v1242_v1 = vld [vmem:[#allocation6 + $0x28] sm:$0xff]   ;;  %v966_v2 = vld [vmem:[%s1498_s4 + $0x4] ss:$0 sm:$0xff]  ;;  %v1245_v12 = vld [vmem:[#allocation6 + $0x78] sm:$0xff]  }
  0x47   :  { %1126 = vmatprep.subr.bf16.mxu0 %v1344_v0  ;;  %v1246_v13 = vld [vmem:[#allocation6 + $0x38] sm:$0xff]   ;;  %v1247_v14 = vld [vmem:[#allocation2 + $0xc0] sm:$0xff]  }
  0x49   :  { %1109 = vmatpush3.bf16.msra.mxu1 %v1195_v8 }
  0x4a   :  { %1110 = vmatprep.subr.bf16.mxu1 %v1344_v0  ;;  %1127 = vmatpush3.bf16.msra.mxu0 %v1202_v15  ;;  %v1248_v15 = vld [vmem:[#allocation2 + $0xc8] sm:$0xff]  }
  0x4b   :  { %1128 = vmatprep.subr.bf16.mxu0 %v1344_v0 }
  0x4d   :  { %1111 = vmatpush3.bf16.msra.mxu1 %v1196_v9 }
  0x4e   :  { %1112 = vmatprep.subr.bf16.mxu1 %v1344_v0  ;;  %1129 = vmatpush3.bf16.msra.mxu0 %v1203_v16  ;;  %v1249_v16 = vld [vmem:[#allocation2 + $0xd0] sm:$0xff]  }
  0x4f   :  { %1130 = vmatprep.subr.bf16.mxu0 %v1344_v0 }
  0x51   :  { %1113 = vmatpush3.bf16.msra.mxu1 %v1197_v10  ;;  %v1243_v10 = vld [vmem:[#allocation6 + $0x70] sm:$0xff]  }
  0x52   :  { %1114 = vmatprep.subr.bf16.mxu1 %v1344_v0  ;;  %1131 = vmatpush3.bf16.msra.mxu0 %v1204_v17  ;;  %v1250_v17 = vld [vmem:[#allocation2 + $0xd8] sm:$0xff]  }
  0x53   :  { %1132 = vmatprep.subr.bf16.mxu0 %v1344_v0 }
  0x55   :  { %1115 = vmatpush3.bf16.msra.mxu1 %v1198_v11  ;;  %v1244_v11 = vld [vmem:[#allocation6 + $0x30] sm:$0xff]  }
  0x56   :  { %1133 = vmatpush3.bf16.msra.mxu0 %v1205_v26  ;;  %467 = vmatprep.subr.bf16.mxu1 %v1209_v29 }
  0x57   :  { %1134 = vmatprep.subr.bf16.mxu0 %v1344_v0 }
  0x5a   :  { %1135 = vmatpush3.bf16.msra.mxu0 %v1206_v27 }
  0x5b   :  { %1054 = vmatprep.subr.bf16.mxu0 %v1231_v53 }
 0x10f   :  { %v120_v19 = vpop.f32.mrb[0].mxu0 }
 0x110   :  { %v121_v20 = vadd.f32 %v952_v18, %v120_v19  ;;  %v1098_v21 = vpop.f32.mrb[1].mxu0  ;;  %v1251_v18 = vld [vmem:[#allocation2 + $0xe0] sm:$0xff]   ;;  %v1252_v19 = vld [vmem:[#allocation2 + $0xe8] sm:$0xff]  }
 0x111   :  { %v123_v22 = vpop.f32.mrb[2].mxu0 }
 0x112   :  { %v126_v23 = vmax.f32 %v121_v20, 0.0  ;;  %v1099_v24 = vpop.f32.mrb[3].mxu0  ;;  %v377_v20 = vlaneseq }
 0x114   :  { %v127_v25 = vpack.c.bf16 %v126_v23, %v126_v23  ;;  %v378_v21 = vshrl.u32 %v377_v20, 7  ;;  %v975_v23 = vld [vmem:[%s1498_s4 + $0x6] sm:$0x3] }
 0x116   :  { %1117 = vmatmul.mubr.bf16.vlgmr.msra.gmra.mrb[0].mxu1 %v127_v25  ;;  %v379_v22 = vsub.s32 0, %v378_v21  ;;  %v383_v24 = vsub.s32 1, %v378_v21 }
 0x117   :  { %468 = vmatpush1.bf16.msra.mxu1 %v1207_v28  ;;  %499 = vmatprep.mubr.bf16.mxu1 %v1346_v52 }
 0x118   :  { %469 = vmatprep.subr.bf16.mxu1 %v1212_v30  ;;  %v380_v25 = vrot.slane %v975_v23, %v379_v22  ;;  %v384_v26 = vrot.slane %v975_v23, %v383_v24 }
 0x11b   :  { %470 = vmatpush1.bf16.msra.mxu1 %v1210_v31 }
 0x11c   :  { %471 = vmatprep.subr.bf16.mxu1 %v1215_v32 }
 0x11f   :  { %472 = vmatpush1.bf16.msra.mxu1 %v1213_v33 }
 0x120   :  { %473 = vmatprep.subr.bf16.mxu1 %v1218_v34 }
 0x123   :  { %474 = vmatpush1.bf16.msra.mxu1 %v1216_v35 }
 0x124   :  { %475 = vmatprep.subr.bf16.mxu1 %v1221_v36 }
 0x127   :  { %476 = vmatpush1.bf16.msra.mxu1 %v1219_v37  ;;  %v1253_v37 = vld [vmem:[#allocation2 + $0xf0] sm:$0xff]  }
 0x128   :  { %477 = vmatprep.subr.bf16.mxu1 %v1224_v38  ;;  %v1254_v38 = vld [vmem:[#allocation2 + $0xf8] sm:$0xff]  }
 0x12b   :  { %478 = vmatpush1.bf16.msra.mxu1 %v1222_v39  ;;  %v1255_v39 = vld [vmem:[#allocation2 + $0x100] sm:$0xff]  }
 0x12c   :  { %479 = vmatprep.subr.bf16.mxu1 %v1227_v40  ;;  %v1256_v40 = vld [vmem:[#allocation2 + $0x108] sm:$0xff]  }
 0x12f   :  { %480 = vmatpush1.bf16.msra.mxu1 %v1225_v41  ;;  %v1257_v41 = vld [vmem:[#allocation2 + $0x110] sm:$0xff]  }
 0x130   :  { %481 = vmatprep.subr.bf16.mxu1 %v1230_v50 }
 0x133   :  { %482 = vmatpush1.bf16.msra.mxu1 %v1228_v51 }
 0x134   :  { %1140 = vmatprep.subr.bf16.mxu1 %v1344_v0 }
 0x1e9   :  { %v235_v43 = vpop.f32.mrb[0].mxu1 }
 0x1ea   :  { %v236_v44 = vadd.f32 %v956_v42, %v235_v43  ;;  %v1118_v45 = vpop.f32.mrb[1].mxu1  ;;  %v1258_v42 = vld [vmem:[#allocation2 + $0x118] sm:$0xff]   ;;  %v1259_v43 = vld [vmem:[#allocation2 + $0x120] sm:$0xff]  }
 0x1eb   :  { %v238_v46 = vpop.f32.mrb[2].mxu1 }
 0x1ec   :  { %v241_v47 = vmax.f32 %v236_v44, 0.0  ;;  %v1119_v48 = vpop.f32.mrb[3].mxu1  ;;  %v1260_v44 = vld [vmem:[#allocation2 + $0x128] sm:$0xff]   ;;  %v993_v46 = vld [vmem:[%s1498_s4 + $0x8] ss:$0 sm:$0xff] }
 0x1ee   :  { %v242_v49 = vpack.c.bf16 %v241_v47, %v241_v47 }
 0x1f0   :  { %1137 = vmatmul.mubr.bf16.vlgmr.msra.gmra.mrb[4].mxu0 %v242_v49 }
 0x1f1   :  { %1055 = vmatpush3.bf16.msra.mxu0 %v1232_v54  ;;  %v1261_v54 = vld [vmem:[#allocation2 + $0x130] sm:$0xff]  }
 0x1f2   :  { %1056 = vmatprep.subr.bf16.mxu0 %v1233_v55  ;;  %v1262_v55 = vld [vmem:[#allocation2 + $0x138] sm:$0xff]  }
 0x1f5   :  { %1057 = vmatpush3.bf16.msra.mxu0 %v1234_v56  ;;  %v1011_v56 = vld [vmem:[%s1498_s4 + $0xa] ss:$0 sm:$0xff] }
 0x1f6   :  { %1058 = vmatprep.subr.bf16.mxu0 %v1235_v57 }
 0x1f9   :  { %1059 = vmatpush3.bf16.msra.mxu0 %v1236_v58 }
 0x1fa   :  { %1060 = vmatprep.subr.bf16.mxu0 %v1237_v59 }
 0x1fd   :  { %1061 = vmatpush3.bf16.msra.mxu0 %v1238_v60 }
 0x1fe   :  { %1062 = vmatprep.subr.bf16.mxu0 %v1239_v61 }
 0x201   :  { %1063 = vmatpush3.bf16.msra.mxu0 %v1240_v62 }
 0x202   :  { %1064 = vmatprep.subr.bf16.mxu0 %v1241_v63 }
 0x205   :  { %1065 = vmatpush3.bf16.msra.mxu0 %v1242_v1  ;;  %v1021_v1 = vld [vmem:[%s1498_s4 + $0xc] ss:$0 sm:$0xff] }
 0x206   :  { %1066 = vmatprep.subr.bf16.mxu0 %v1243_v10 }
 0x209   :  { %1067 = vmatpush3.bf16.msra.mxu0 %v1244_v11 }
 0x20a   :  { %1068 = vmatprep.subr.bf16.mxu0 %v1245_v12 }
 0x20d   :  { %1069 = vmatpush3.bf16.msra.mxu0 %v1246_v13 }
 0x20e   :  { %1160 = vmatprep.subr.bf16.mxu0 %v1344_v0 }
 0x2c3   :  { %v350_v3 = vpop.f32.mrb[4].mxu0 }
 0x2c4   :  { %v351_v4 = vadd.f32 %v966_v2, %v350_v3  ;;  %v1138_v5 = vpop.f32.mrb[5].mxu0 }
 0x2c5   :  { %v353_v6 = vpop.f32.mrb[6].mxu0  ;;  %v1030_v5 = vld [vmem:[%s1499_s5] ss:$0 sm:$0xff] }
 0x2c6   :  { %v356_v7 = vmax.f32 %v351_v4, 0.0  ;;  %v1139_v8 = vpop.f32.mrb[7].mxu0 }
 0x2c8   :  { %v357_v9 = vpack.c.bf16 %v356_v7, %v356_v7 }
 0x2ca   :  { %500 = vmatmul.mubr.bf16.vlgmr.msra.gmra.mrb[4].mxu1 %v357_v9  ;;  %v1032_v9 = vld [vmem:[%s1498_s4 + $0xe] ss:$0 sm:$0xff] }
 0x2cb   :  { %1156 = vmatprep.mubr.msk.bf16.mxu1 %vm1345_vm0, %v1344_v0  ;;  %1141 = vmatpush3.bf16.msra.mxu1 %v1247_v14 }
 0x2cc   :  { %1142 = vmatprep.subr.bf16.mxu1 %v1344_v0 }
 0x2cf   :  { %1143 = vmatpush3.bf16.msra.mxu1 %v1248_v15 }
 0x2d0   :  { %1144 = vmatprep.subr.bf16.mxu1 %v1344_v0 }
 0x2d3   :  { %1145 = vmatpush3.bf16.msra.mxu1 %v1249_v16 }
 0x2d4   :  { %1146 = vmatprep.subr.bf16.mxu1 %v1344_v0 }
 0x2d7   :  { %1147 = vmatpush3.bf16.msra.mxu1 %v1250_v17 }
 0x2d8   :  { %1148 = vmatprep.subr.bf16.mxu1 %v1344_v0 }
 0x2db   :  { %1149 = vmatpush3.bf16.msra.mxu1 %v1251_v18 }
 0x2dc   :  { %1150 = vmatprep.subr.bf16.mxu1 %v1344_v0 }
 0x2df   :  { %1151 = vmatpush3.bf16.msra.mxu1 %v1252_v19 }
 0x2e0   :  { %1152 = vmatprep.subr.bf16.mxu1 %v1344_v0 }
 0x2e3   :  { %1153 = vmatpush3.bf16.msra.mxu1 %v1253_v37 }
 0x2e4   :  { %1154 = vmatprep.subr.bf16.mxu1 %v1344_v0 }
 0x2e7   :  { %1155 = vmatpush3.bf16.msra.mxu1 %v1254_v38 }
 0x39d   :  { %v501_v27 = vpop.f32.mrb[4].mxu1 }
 0x39e   :  { %v502_v28 = vadd.f32 %v501_v27, %v380_v25  ;;  %v503_v29 = vpop.f32.mrb[5].mxu1 }
 0x39f   :  { %v504_v30 = vadd.f32 %v503_v29, %v384_v26  ;;  %v505_v31 = vpop.f32.mrb[6].mxu1 }
 0x3a0   :  { %v508_v32 = vmax.f32 %v502_v28, 0.0  ;;  %v506_v33 = vpop.f32.mrb[7].mxu1 }
 0x3a1   :  { %v509_v34 = vmax.f32 %v504_v30, 0.0 }
 0x3a2   :  { %v510_v36 = vpack.c.bf16 %v508_v32, %v508_v32 }
 0x3a3   :  { %v511_v35 = vpack.c.bf16 %v509_v34, %v509_v34 }
 0x3a5   :  { %680 = vmatprep.mubr.bf16.mxu0 %v511_v35 }
 0x3a6   :  { %681 = vmatmul.mubr.bf16.vlgmr.msra.gmra.mrb[8].mxu0 %v510_v36 }
 0x3a7   :  { %1176 = vmatprep.mubr.msk.bf16.mxu0 %vm1345_vm0, %v1344_v0  ;;  %1161 = vmatpush3.bf16.msra.mxu0 %v1255_v39 }
 0x3a8   :  { %1162 = vmatprep.subr.bf16.mxu0 %v1344_v0 }
 0x3ab   :  { %1163 = vmatpush3.bf16.msra.mxu0 %v1256_v40 }
 0x3ac   :  { %1164 = vmatprep.subr.bf16.mxu0 %v1344_v0 }
 0x3af   :  { %1165 = vmatpush3.bf16.msra.mxu0 %v1257_v41 }
 0x3b0   :  { %1166 = vmatprep.subr.bf16.mxu0 %v1344_v0 }
 0x3b3   :  { %1167 = vmatpush3.bf16.msra.mxu0 %v1258_v42 }
 0x3b4   :  { %1168 = vmatprep.subr.bf16.mxu0 %v1344_v0 }
 0x3b7   :  { %1169 = vmatpush3.bf16.msra.mxu0 %v1259_v43 }
 0x3b8   :  { %1170 = vmatprep.subr.bf16.mxu0 %v1344_v0 }
 0x3bb   :  { %1171 = vmatpush3.bf16.msra.mxu0 %v1260_v44 }
 0x3bc   :  { %1172 = vmatprep.subr.bf16.mxu0 %v1344_v0 }
 0x3bf   :  { %1173 = vmatpush3.bf16.msra.mxu0 %v1261_v54 }
 0x3c0   :  { %1174 = vmatprep.subr.bf16.mxu0 %v1344_v0 }
 0x3c3   :  { %1175 = vmatpush3.bf16.msra.mxu0 %v1262_v55 }
 0x479   :  { %v1070_v45 = vpop.f32.mrb[8].mxu0 }
 0x47a   :  { %v1071_v47 = vpop.f32.mrb[9].mxu0 }
 0x47b   :  { %v1072_v48 = vadd.f32 %v1071_v47, %v1070_v45  ;;  %v1073_v49 = vpop.f32.mrb[10].mxu0 }
 0x47c   :  { %v1074_v50 = vpop.f32.mrb[11].mxu0 }
 0x47d   :  { %v683_v51 = vadd.f32 %v1072_v48, %v993_v46 }
 0x47f   :  { %v688_v52 = vmax.f32 %v683_v51, 0.0 }
 0x481   :  { %v689_v53 = vpack.c.bf16 %v688_v52, %v688_v52 }
 0x483   :  { %1157 = vmatmul.mubr.bf16.vlgmr.msra.gmra.mrb[8].mxu1 %v689_v53 }
 0x556   :  { %v797_v57 = vpop.f32.mrb[8].mxu1 }
 0x557   :  { %v798_v58 = vadd.f32 %v1011_v56, %v797_v57  ;;  %v1158_v59 = vpop.f32.mrb[9].mxu1 }
 0x558   :  { %v800_v60 = vpop.f32.mrb[10].mxu1 }
 0x559   :  { %v803_v61 = vmax.f32 %v798_v58, 0.0  ;;  %v1159_v62 = vpop.f32.mrb[11].mxu1 }
 0x55b   :  { %v804_v63 = vpack.c.bf16 %v803_v61, %v803_v61 }
 0x55d   :  { %1177 = vmatmul.mubr.bf16.vlgmr.msra.gmra.mrb[12].mxu0 %v804_v63 }
 0x630   :  { %v912_v2 = vpop.f32.mrb[12].mxu0 }
 0x631   :  { %v913_v0 = vadd.f32 %v1021_v1, %v912_v2  ;;  %v1178_v3 = vpop.f32.mrb[13].mxu0 }
 0x632   :  { %v915_v4 = vpop.f32.mrb[14].mxu0 }
 0x633   :  { %v918_v6 = vmax.f32 %v913_v0, 0.0  ;;  %v1179_v7 = vpop.f32.mrb[15].mxu0 }
 0x635   :  { %v926_v8 = vmul.f32 %v1030_v5, %v918_v6 }
 0x637   :  { %927 = vadd.xlane.f32.xlu0 %v926_v8 }
 0x6c4   :  { %v928_v10 = vpop.xlane.xlu0 %927 }
 0x6c5   :  { %v937_v11 = vadd.f32 %v1032_v9, %v928_v10 }
 0x6c7   :  { %v1033_v12 = vmul.f32 -1.442695, %v937_v11 }
 0x6c9   :  { %1263 = vpow2.f32 %v1033_v12 }
 0x6d3   :  { %v1264_v13 = vpop.eup %1263 }
 0x6d4   :  { %v941_v14 = vadd.f32 1.0, %v1264_v13 }
 0x6d6   :  { %1265 = vrcp.f32 %v941_v14 }
 0x6e0   :  { %v1266_v15 = vpop.eup %1265 }
 0x6e1   :  { %945 = vst.msk [vmem:[%s1500_s6] sm:$0xff] %vm944_vm2, %v1266_v15 }
 0x6e2   :  { %950 = vsyncpa [#allocation3], 1 }
 0x6e3   :  { %951 = vsyncpa [#allocation5], 1 }

</bundles_post_ra>
